<compile_context>
chip_gen: v7x
topology: tpu7x:2x2x1
jax: 0.10.0
libtpu: 0.0.40
codegen_flags: <defaults>
</compile_context>

<pallas_src>
import jax
import jax.numpy as jnp
from jax import lax
from jax.experimental import pallas as pl
from jax.experimental.pallas import tpu as pltpu

NUM_ITERATIONS = 5  # self.num_iterations


def _pick_block_batch(B, D, N, cap=64, vmem_budget=24 << 20):
    """Batches per grid step: big enough to amortize per-step overhead, small
    enough that double-buffered blocks fit comfortably in VMEM, and keep >=2
    grid steps when B > 1 so megacore (v7x) can shard the parallel axis."""
    # bytes per batch element across both kernels (double-buffered, fp32).
    per_b = 4 * (D * N + N + 2 * D * D + 2 * D) * 2
    tb = max(1, min(B, cap, vmem_budget // max(per_b, 1)))
    if B > 1:
        tb = min(tb, -(-B // 2))   # ceil(B/2) -> at least 2 grid steps
    return max(tb, 1)


# ---------------------------------------------------------------------------
# Kernel 1: per batch  S = A^T A  (D,D)  and  Aty = A^T y  (1,D)
#   inputs:  At (TB, D, N), y3 (TB, 1, N)   -- all contractions over last dims
# ---------------------------------------------------------------------------
def _gram_kernel(at_ref, y_ref, s_ref, aty_ref):
    at = at_ref[...]                                               # (TB, D, N)
    s_ref[...] = jnp.einsum('bdn,ben->bde', at, at,
                            preferred_element_type=jnp.float32)    # (TB, D, D)
    aty_ref[...] = jnp.einsum('bmn,bdn->bmd', y_ref[...], at,
                              preferred_element_type=jnp.float32)  # (TB, 1, D)


def gram_aty(At, y3, tb):
    Bp, D, N = At.shape
    return pl.pallas_call(
        _gram_kernel,
        out_shape=(jax.ShapeDtypeStruct((Bp, D, D), jnp.float32),
                   jax.ShapeDtypeStruct((Bp, 1, D), jnp.float32)),
        grid_spec=pltpu.PrefetchScalarGridSpec(
            num_scalar_prefetch=0,
            grid=(Bp // tb,),
            in_specs=[pl.BlockSpec((tb, D, N), lambda b: (b, 0, 0)),
                      pl.BlockSpec((tb, 1, N), lambda b: (b, 0, 0))],
            out_specs=(pl.BlockSpec((tb, D, D), lambda b: (b, 0, 0)),
                       pl.BlockSpec((tb, 1, D), lambda b: (b, 0, 0)))),
        compiler_params=pltpu.CompilerParams(
            dimension_semantics=("parallel",)),
    )(At, y3)


# ---------------------------------------------------------------------------
# Kernel 2: X0 = alpha*S ; X <- 2X - (X S) X  (NUM_ITERATIONS times) ;
#           w = X @ (A^T y)    (alpha arrives via scalar prefetch / SMEM)
# ---------------------------------------------------------------------------
def _newton_kernel(alpha_ref, s_ref, aty_ref, w_ref):
    alpha = alpha_ref[0]                                           # SMEM scalar
    S = s_ref[...]                                                 # (TB, D, D)
    X0 = alpha * S

    def body(_, Xk):
        XS = jnp.einsum('bij,bjk->bik', Xk, S,
                        preferred_element_type=jnp.float32)
        return 2.0 * Xk - jnp.einsum('bij,bjk->bik', XS, Xk,
                                     preferred_element_type=jnp.float32)

    X = lax.fori_loop(0, NUM_ITERATIONS, body, X0, unroll=True)

    # w_row = (A^T y)_row @ X^T == (X @ A^T y)^T ; contract last dims of both.
    w_ref[...] = jnp.einsum('bmd,bed->bme', aty_ref[...], X,
                            preferred_element_type=jnp.float32)    # (TB, 1, D)


def newton_solve(alpha, S, Aty, tb):
    Bp, D, _ = S.shape
    return pl.pallas_call(
        _newton_kernel,
        out_shape=jax.ShapeDtypeStruct((Bp, 1, D), jnp.float32),
        grid_spec=pltpu.PrefetchScalarGridSpec(
            num_scalar_prefetch=1,          # alpha -> SMEM
            grid=(Bp // tb,),
            in_specs=[pl.BlockSpec((tb, D, D), lambda b, a_ref: (b, 0, 0)),
                      pl.BlockSpec((tb, 1, D), lambda b, a_ref: (b, 0, 0))],
            out_specs=pl.BlockSpec((tb, 1, D), lambda b, a_ref: (b, 0, 0))),
        compiler_params=pltpu.CompilerParams(
            dimension_semantics=("parallel",)),
    )(alpha, S, Aty)


# ---------------------------------------------------------------------------
# Full forward pass, matching PyTorch semantics (global lambda_max over batch).
# ---------------------------------------------------------------------------
def iterated_newton_forward(A, y, tb=None):
    B, N, D = A.shape
    A = A.astype(jnp.float32)
    y = y.astype(jnp.float32)
    if tb is None:
        tb = _pick_block_batch(B, D, N)

    # Layout plumbing in plain JAX (cheap): transposed A and row-vector y.
    At = jnp.swapaxes(A, 1, 2)                      # (B, D, N)
    y3 = y[:, None, :]                              # (B, 1, N)

    # Pad batch to a multiple of tb (zero batches stay zero, dropped at the end).
    Bp = -(-B // tb) * tb
    if Bp != B:
        At = jnp.pad(At, ((0, Bp - B), (0, 0), (0, 0)))
        y3 = jnp.pad(y3, ((0, Bp - B), (0, 0), (0, 0)))

    S, Aty = gram_aty(At, y3, tb)                   # Pallas kernel 1

    # TODO(synk): eigvalsh has no clean Pallas equivalent; computed in plain JAX.
    # S = A^T A is symmetric PSD => lambda_max(S S^T) = lambda_max(S)^2, so the
    # reference's S S^T matmul is skipped entirely. Global max matches .item().
    lam = jnp.max(jnp.linalg.eigvalsh(S[:B]))
    alpha = (2.0 / (lam * lam)).astype(jnp.float32).reshape((1,))

    w3 = newton_solve(alpha, S, Aty, tb)            # Pallas kernel 2, (Bp, 1, D)
    return w3[:B, 0, :]                             # (B, D)


if __name__ == "__main__":
    key = jax.random.PRNGKey(0)
    B, N, D = 8, 16, 8                              # batch, samples, input_dim
    kA, ky = jax.random.split(key)
    A = jax.random.normal(kA, (B, N, D), dtype=jnp.float32)
    y = jax.random.normal(ky, (B, N), dtype=jnp.float32)

    w = jax.block_until_ready(iterated_newton_forward(A, y))

    # Pure-JAX reference mirroring the PyTorch module exactly.
    S_ref = jnp.einsum('bnd,bne->bde', A, A)
    SS_T = jnp.einsum('bde,bfe->bdf', S_ref, S_ref)
    lam_ref = jnp.max(jnp.linalg.eigvalsh(SS_T))
    X_ref = (2.0 / lam_ref) * S_ref
    for _ in range(NUM_ITERATIONS):
        X_ref = 2.0 * X_ref - X_ref @ S_ref @ X_ref
    w_ref = jnp.squeeze(X_ref @ jnp.swapaxes(A, 1, 2) @ y[..., None], -1)

    assert w.shape == (B, D)
    assert bool(jnp.all(jnp.isfinite(w)))
    assert bool(jnp.allclose(w, w_ref, rtol=1e-2, atol=1e-2))
    print("KERNEL_OK")
</pallas_src>

<mosaic_0001>
module attributes {stable_mosaic.version = 11 : i64} {
  func.func @_gram_kernel(%arg0: i32, %arg1: memref<4x8x16xf32, #tpu.memory_space<vmem>>, %arg2: memref<4x1x16xf32, #tpu.memory_space<vmem>>, %arg3: memref<4x8x8xf32, #tpu.memory_space<vmem>>, %arg4: memref<4x1x8xf32, #tpu.memory_space<vmem>>) attributes {dimension_semantics = [#tpu.dimension_semantics<parallel>], iteration_bounds = array<i64: 2>, scalar_prefetch = 0 : i64, scratch_operands = 0 : i64, tpu.core_type = #tpu.core_type<tc>, window_params = [{transform_indices = @transform_0, window_bounds = array<i64: 4, 8, 16>}, {transform_indices = @transform_1, window_bounds = array<i64: 4, 1, 16>}, {transform_indices = @transform_2, window_bounds = array<i64: 4, 8, 8>}, {transform_indices = @transform_3, window_bounds = array<i64: 4, 1, 8>}]} {
    %c0 = arith.constant 0 : index
    %c0_0 = arith.constant 0 : index
    %c0_1 = arith.constant 0 : index
    %0 = vector.load %arg1[%c0, %c0_0, %c0_1] : memref<4x8x16xf32, #tpu.memory_space<vmem>>, vector<4x8x16xf32>
    "tpu.trace_start"() <{level = 10 : i32, message = "bdn,ben->bde"}> : () -> ()
    %cst = arith.constant dense<0.000000e+00> : vector<4x8x8xf32>
    %1 = tpu.matmul %0, %0, %cst {dimension_numbers = #tpu.dot_dimension_numbers<[2], [2], [1], [1], [0, 0, 0, 1, 1, 1], [0], [0]>} : vector<4x8x16xf32>, vector<4x8x16xf32>, vector<4x8x8xf32> -> vector<4x8x8xf32>
    "tpu.trace_stop"() : () -> ()
    %c0_2 = arith.constant 0 : index
    %c0_3 = arith.constant 0 : index
    %c0_4 = arith.constant 0 : index
    %2 = vector.load %arg3[%c0_2, %c0_3, %c0_4] : memref<4x8x8xf32, #tpu.memory_space<vmem>>, vector<4x8x8xf32>
    tpu.vector_store %arg3[%c0_2, %c0_3, %c0_4], %1 {strides = array<i32>} : memref<4x8x8xf32, #tpu.memory_space<vmem>>, vector<4x8x8xf32>,
    %c0_5 = arith.constant 0 : index
    %c0_6 = arith.constant 0 : index
    %c0_7 = arith.constant 0 : index
    %3 = vector.load %arg2[%c0_5, %c0_6, %c0_7] : memref<4x1x16xf32, #tpu.memory_space<vmem>>, vector<4x1x16xf32>
    "tpu.trace_start"() <{level = 10 : i32, message = "bmn,bdn->bmd"}> : () -> ()
    %cst_8 = arith.constant dense<0.000000e+00> : vector<4x1x8xf32>
    %4 = tpu.matmul %3, %0, %cst_8 {dimension_numbers = #tpu.dot_dimension_numbers<[2], [2], [1], [1], [0, 0, 0, 1, 1, 1], [0], [0]>} : vector<4x1x16xf32>, vector<4x8x16xf32>, vector<4x1x8xf32> -> vector<4x1x8xf32>
    "tpu.trace_stop"() : () -> ()
    %c0_9 = arith.constant 0 : index
    %c0_10 = arith.constant 0 : index
    %c0_11 = arith.constant 0 : index
    %5 = vector.load %arg4[%c0_9, %c0_10, %c0_11] : memref<4x1x8xf32, #tpu.memory_space<vmem>>, vector<4x1x8xf32>
    tpu.vector_store %arg4[%c0_9, %c0_10, %c0_11], %4 {strides = array<i32>} : memref<4x1x8xf32, #tpu.memory_space<vmem>>, vector<4x1x8xf32>,
    return
  }
  func.func @transform_0(%arg0: i32) -> (i32, i32, i32) {
    %c0_i32 = arith.constant 0 : i32
    %c0_i32_0 = arith.constant 0 : i32
    %c0_i32_1 = arith.constant 0 : i32
    return %arg0, %c0_i32, %c0_i32_0 : i32, i32, i32
  }
  func.func @transform_1(%arg0: i32) -> (i32, i32, i32) {
    %c0_i32 = arith.constant 0 : i32
    %c0_i32_0 = arith.constant 0 : i32
    %c0_i32_1 = arith.constant 0 : i32
    return %arg0, %c0_i32, %c0_i32_0 : i32, i32, i32
  }
  func.func @transform_2(%arg0: i32) -> (i32, i32, i32) {
    %c0_i32 = arith.constant 0 : i32
    %c0_i32_0 = arith.constant 0 : i32
    %c0_i32_1 = arith.constant 0 : i32
    return %arg0, %c0_i32, %c0_i32_0 : i32, i32, i32
  }
  func.func @transform_3(%arg0: i32) -> (i32, i32, i32) {
    %c0_i32 = arith.constant 0 : i32
    %c0_i32_0 = arith.constant 0 : i32
    %c0_i32_1 = arith.constant 0 : i32
    return %arg0, %c0_i32, %c0_i32_0 : i32, i32, i32
  }
}

</mosaic_0001>

<bundles_post_ra>
// kernel: tpu_custom_call.1
= control target key start
LH: loop header
LB: loop body
LE: loop exit
PB: predicated region body
PF: predicated region fallthrough
CT: control target
= control target key end

     0   :  { %9 = vsyncpa [#allocation3], 0  ;;  %s1667_s0 = inlined_call_operand.hbm [shape: f32[8,8,16], index: 0, kind: input, shape index: {}]   ;;  %s1668_s1 = inlined_call_operand.hbm [shape: f32[8,1,16], index: 1, kind: input, shape index: {}]   ;;  %s1669_s2 = inlined_call_operand.hbm [shape: f32[8,8,8], index: 2, kind: output, shape index: {0}]   ;;  %s1670_s3 = inlined_call_operand.hbm [shape: f32[8,1,8], index: 3, kind: output, shape index: {1}]  }
   0x1   :  { %11 = vsyncpa [#allocation3 + $0x1], 0 }
   0x2   :  { %12 = vsyncpa [#allocation6], 0 }
   0x3   :  { %14 = vsyncpa [#allocation6 + $0x1], 0 }
   0x4   :  { %15 = vsyncpa [#allocation4], 0 }
   0x5   :  { %17 = vsyncpa [#allocation4 + $0x1], 0 }
   0x6   :  { %18 = vsyncpa [#allocation9], 0 }
   0x7   :  { %20 = vsyncpa [#allocation9 + $0x1], 0  ;;  %s1372_s12 = smov 0   ;;  %s1374_s13 = smov 0  }
   0x8   :  { %s1376_s14 = smov 0   ;;  %s1378_s15 = smov 0  }
   0x9 LB: > { %s1393_s16 = sadd.s32 4294967295, %s1336_s15   ;;  %s1010_s17 = sadd.s32 4294967294, %s1336_s15   ;;  %s1336_s15 = sphi %s1378_s15, %s1686_s15   ;;  %s1332_s14 = sphi %s1376_s14, %s1685_s14   ;;  %s1328_s13 = sphi %s1374_s13, %s1684_s13   ;;  %s1324_s12 = sphi %s1372_s12, %s1683_s12  }
   0xa   : > { %s1397_s18 = sadd.s32 1, %s1336_s15   ;;  %s33_s19 = sadd.s32 1, %s1332_s14 }
   0xb   : > { %s30_s20 = ssub.s32 %s1336_s15, %s1397_s18  ;;  %p40_p0 = scmp.ne.s32.totalorder %s1332_s14, %s1328_s13 }
   0xc   : > { %p31_p1 = scmp.eq.s32.totalorder %s30_s20, 0  ;;  %p41_p2 = scmp.eq.s32.totalorder %s1336_s15, 0 }
   0xd   : > { %p46_p3 = scmp.ne.s32.totalorder %s1328_s13, %s1324_s12  ;;  %p47_p4 = scmp.eq.s32.totalorder %s1393_s16, 0 }
   0xe   : > { %s1409_s21 = scalar_select %p31_p1, %s1332_s14, %s33_s19  }
   0xf   : > { %p1411_p5 = por %p41_p2, %p40_p0  ;;  %p1415_p6 = por %p47_p4, %p46_p3 }
  0x10   : > { %p96_p7 = scmp.eq.s32.totalorder %s1393_s16, 1  ;;  %p102_p8 = scmp.eq.s32.totalorder %s1010_s17, 1 }
  0x11   : > { %s1674_s23 = scalar_select %p1415_p6, 1, 0 }
  0x12   : > { %p1130_p10 = scmp.lt.s32.totalorder %s1336_s15, 2  ;;  %p1422_p11 = por %p96_p7, %p40_p0 }
  0x13   : > { %p1426_p12 = por %p102_p8, %p46_p3  ;;  %s1431_s26 = sand.u32 1, %s1332_s14  }
  0x14   : > { %s1675_s24 = scalar_select %p1422_p11, 1, 0 }
  0x15   : > { %s1676_s25 = scalar_select %p1426_p12, 1, 0 }
  0x16   : > { %s1048_s27 = sshll.u32 %s1336_s15, 9  ;;  %s1013_s28 = sshll.u32 %s1431_s26, 5 }
  0x17   : > { %s1438_s4 = scalar_lea.hbm %s1667_s0, %s1048_s27  ;;  %s152_s5 = scalar_lea.vmem [#allocation2], %s1013_s28 }
  0x18   : > { %s159_s6 = sshll.u32 %s152_s5, 4  ;;  %p1442_p13 = pnand %p1130_p10, %p1411_p5  ;;  %s1446_s6 = int_to_ptr.vmem [resolvable:$true] %s159_s6 }
  0x19   : > { %s149_s8 = scalar_lea.sflag [#allocation3], %s1431_s26  ;;  %s1174_s9 = scalar_lea.hbm %s1438_s4, 512 }
  0x1a   : > { %p1175_p0 = scmp.ne.s32.totalorder %s1438_s4, %s1174_s9  ;;  %p1176_p1 = pneg %p1442_p13 }
  0x1b   : > { %s1179_s17 = scalar_lea.hbm %s1667_s0, 1024  ;;  %p1180_p4 = scmp.lt.u32.totalorder %s1438_s4, %s1667_s0 }
  0x1c   : > { %p1177_p2 = pnand %p1176_p1, %p1175_p0  ;;  %p1181_p5 = scmp.lt.u32.totalorder %s1179_s17, %s1174_s9 }
  0x1d   : > { %p1183_p8 = scmp.lt.u32.totalorder %s1174_s9, %s1438_s4 }
  0x1e   : > { %p1178_p3 = pneg %p1177_p2  ;;  %p1182_p7 = por %p1181_p5, %p1180_p4 }
  0x20   : > { %p1184_p10 = por %p1183_p8, %p1182_p7 }
  0x22   : > { %p1185_p9 = pnand %p1184_p10, %p1178_p3 }
  0x24   : > { %1188 = shalt.err (!%p1185_p9)
}
  0x25   : > { %s1189_s22 = scalar_lea.vmem %s1446_s6, 512  ;;  %s1338_s27 = smov [#allocation2]  }
  0x26   : > { %p1190_p0 = scmp.ne.s32.totalorder %s1446_s6, %s1189_s22  ;;  %s1194_s28 = sshll.u32 %s1338_s27, 4  ;;  %s1195_s28 = int_to_ptr.vmem [resolvable:$false] %s1194_s28 }
  0x27   : > { %s1196_s29 = scalar_lea.vmem %s1195_s28, 1024  ;;  %p1197_p11 = scmp.lt.s32.totalorder %s1446_s6, %s1195_s28 }
  0x28   : > { %p1192_p2 = pnand %p1190_p0, %p1176_p1  ;;  %p1198_p4 = scmp.lt.s32.totalorder %s1196_s29, %s1189_s22 }
  0x2a   : > { %p1193_p12 = pneg %p1192_p2  ;;  %p1199_p5 = por %p1198_p4, %p1197_p11 }
  0x2c   : > { %p1200_p7 = pnand %p1199_p5, %p1193_p12 }
  0x2e   : > { %1203 = shalt.err (!%p1200_p7)
}
  0x2f   : > { %s1339_s30 = smov 128   ;;  %s1340_s5 = smov 8  }
  0x30   : > { %1119 = dma.hbm_to_vmem [thread:$0]  (!%p1442_p13), %s1438_s4, 512, %s1446_s6, %s149_s8, %s1339_s30, %s1339_s30, %s1340_s5  }
  0x31   : > { %p1019_p9 = scmp.ge.s32.totalorder %s1336_s15, 1  ;;  %p188_p3 = scmp.lt.s32.totalorder %s1336_s15, 3 }
  0x32   : > { %s1016_s9 = sshll.u32 %s1431_s26, 2  ;;  %s1049_s11 = sshll.u32 %s1336_s15, 6 }
  0x33   : > { %p1479_p11 = pnand %p1019_p9, %p188_p3  ;;  %s173_s17 = scalar_lea.vmem [#allocation5], %s1016_s9 }
  0x34   : > { %s180_s19 = sshll.u32 %s173_s17, 4  ;;  %s1487_s27 = scalar_lea.hbm %s1668_s1, %s1049_s11  ;;  %s1489_s19 = int_to_ptr.vmem [resolvable:$true] %s180_s19 }
  0x35   : > { %s170_s4 = scalar_lea.sflag [#allocation6], %s1431_s26  ;;  %s1204_s6 = scalar_lea.hbm %s1487_s27, 64 }
  0x36   : > { %p1205_p12 = scmp.ne.s32.totalorder %s1487_s27, %s1204_s6  ;;  %s1209_s29 = scalar_lea.hbm %s1668_s1, 128 }
  0x37   : > { %p1210_p0 = scmp.lt.u32.totalorder %s1487_s27, %s1668_s1  ;;  %p1211_p2 = scmp.lt.u32.totalorder %s1209_s29, %s1204_s6 }
  0x38   : > { %p1207_p8 = pnand %p1205_p12, %p1176_p1  ;;  %p1213_p5 = scmp.lt.u32.totalorder %s1204_s6, %s1487_s27 }
  0x39   : > { %p1212_p4 = por %p1211_p2, %p1210_p0 }
  0x3a   : > { %p1208_p10 = pneg %p1207_p8 }
  0x3b   : > { %p1214_p7 = por %p1213_p5, %p1212_p4 }
  0x3d   : > { %p1215_p9 = pnand %p1214_p7, %p1208_p10 }
  0x3f   : > { %1218 = shalt.err (!%p1215_p9)
}
  0x40   : > { %s1219_s9 = scalar_lea.vmem %s1489_s19, 64  ;;  %s1341_s11 = smov [#allocation5]  }
  0x41   : > { %p1220_p3 = scmp.ne.s32.totalorder %s1489_s19, %s1219_s9  ;;  %s1224_s17 = sshll.u32 %s1341_s11, 4  ;;  %s1225_s17 = int_to_ptr.vmem [resolvable:$false] %s1224_s17 }
  0x42   : > { %s1226_s20 = scalar_lea.vmem %s1225_s17, 128  ;;  %p1227_p6 = scmp.lt.s32.totalorder %s1489_s19, %s1225_s17 }
  0x43   : > { %p1222_p12 = pnand %p1220_p3, %p1176_p1  ;;  %p1228_p0 = scmp.lt.s32.totalorder %s1226_s20, %s1219_s9 }
  0x45   : > { %p1223_p8 = pneg %p1222_p12  ;;  %p1229_p2 = por %p1228_p0, %p1227_p6 }
  0x47   : > { %p1230_p4 = pnand %p1229_p2, %p1223_p8 }
  0x49   : > { %1233 = shalt.err (!%p1230_p4)
}
  0x4a   : > { %s1342_s22 = smov 16   ;;  %s1343_s6 = smov 1  }
  0x4b   : > { %1122 = dma.hbm_to_vmem [thread:$0]  (!%p1442_p13), %s1487_s27, 64, %s1489_s19, %s170_s4, %s1342_s22, %s1342_s22, %s1343_s6  }
  0x4c   : > { %192 = sbr.rel (%p1479_p11) target bundleno = 349 (0x15d), region = 28  ;;  %s1520_s8 = sand.u32 (!%p1479_p11), 1, %s1328_s13  }
  0x4d   : > { %s1020_s28 = sshll.u32 (!%p1479_p11), %s1520_s8, 5  ;;  %s195_s29 = scalar_lea.sflag (!%p1479_p11), [#allocation3], %s1520_s8 }
  0x4e   : > { %s198_s30 = scalar_lea.vmem (!%p1479_p11), [#allocation2], %s1020_s28  ;;  %p1679_p6 = scmp.ne.s32.totalorder (!%p1479_p11), %s1674_s23, 0 }
  0x53   : > { %1307 = dma.done.wait (%p1679_p6), %s195_s29, 512  }
  0x54   : > { %1309 = vsyncadd (%p1679_p6), %s195_s29, 4294966784  ;;  %s1021_s26 = sshll.u32 %s1520_s8, 2  ;;  %s204_s7 = scalar_lea.sflag [#allocation6], %s1520_s8 }
  0x55   : > { %s1534_s10 = scalar_lea.vmem [#allocation5], %s1021_s26 }
  0x56   : > { %1311 = dma.done.wait (%p1679_p6), %s204_s7, 64  }
  0x57   : > { %1313 = vsyncadd (%p1679_p6), %s204_s7, 4294967232  ;;  %v1344_v0 = vmov 0.0   ;;  %vm1345_vm0 = vmmov 0   ;;  %vm248_vm1 = vcmask 130048   ;;  %v244_v1 = vld [vmem:[%s198_s30] sm:$0xff]  ;;  %v245_v2 = vld [vmem:[%s198_s30 + $0x8] sm:$0xff] }
  0x58   : > { %1068 = vmatprep.subr.mxu0 %v1344_v0  ;;  %1073 = vmatprep.subr.mxu1 %v1344_v0  ;;  %v246_v3 = vld [vmem:[%s198_s30 + $0x10] sm:$0xff]  ;;  %v247_v4 = vld [vmem:[%s198_s30 + $0x18] sm:$0xff]  ;;  %v546_v5 = vld [vmem:[%s1534_s10] sm:$0x1]  ;;  %vm541_vm2 = vcmask 64512   ;;  %s232_s23 = scalar_lea.vmem [#allocation7], %s1020_s28 }
  0x59   : > { %1070 = vmatprep.mubr.msk.f32.mxu0 %vm1345_vm0, %v1344_v0  ;;  %1075 = vmatprep.mubr.msk.f32.mxu1 %vm1345_vm0, %v1344_v0  ;;  %v547_v6 = vld [vmem:[%s1534_s10 + $0x1] sm:$0x1]  ;;  %v548_v7 = vld [vmem:[%s1534_s10 + $0x2] sm:$0x1]  ;;  %v549_v8 = vld [vmem:[%s1534_s10 + $0x3] sm:$0x1] }
  0x5a   : > { %1069 = vmatpush3.xpose.msk.msra.mxu0 %vm248_vm1, %v244_v1  ;;  %1074 = vmatpush3.xpose.msk.msra.mxu1 %vm248_vm1, %v245_v2  ;;  %s866_s19 = sshll.u32 %s232_s23, 4  ;;  %s1050_s27 = sshll.u32 %s1393_s16, 9  ;;  %vm842_vm3 = vcmask 57344   ;;  %s1571_s19 = int_to_ptr.vmem [resolvable:$true] %s866_s19 }
  0x5b   : > { %1078 = vmatprep.subr.mxu0 %v1344_v0  ;;  %1083 = vmatprep.subr.mxu1 %v1344_v0  ;;  %s1576_s9 = scalar_lea.hbm %s1669_s2, %s1050_s27  ;;  %s1580_s11 = scalar_lea.vmem [#allocation8], %s1021_s26 }
  0x5c   : > { %s882_s17 = sshll.u32 %s1580_s11, 4  ;;  %s848_s20 = scalar_lea.sflag [#allocation4], %s1520_s8  ;;  %s1612_s17 = int_to_ptr.vmem [resolvable:$true] %s882_s17 }
  0x5d   : > { %1071 = vmatmul.mubr.msk.f32.vlgmr.msra.gmra.mrb[0].mxu0 %vm248_vm1, %v244_v1  ;;  %1076 = vmatmul.mubr.msk.f32.vlgmr.msra.gmra.mrb[0].mxu1 %vm248_vm1, %v245_v2  ;;  %s1234_s22 = scalar_lea.vmem %s1571_s19, 512  ;;  %p1680_p1 = scmp.ne.s32.totalorder %s1675_s24, 0 }
  0x5e   : > { %1079 = vmatpush3.xpose.msk.msra.mxu0 %vm248_vm1, %v246_v3  ;;  %1084 = vmatpush3.xpose.msk.msra.mxu1 %vm248_vm1, %v247_v4  ;;  %p1235_p13 = scmp.ne.s32.totalorder %s1571_s19, %s1234_s22  ;;  %s1346_s6 = smov [#allocation7]  }
  0x5f   : > { %1080 = vmatprep.mubr.msk.f32.mxu0 %vm1345_vm0, %v1344_v0  ;;  %1085 = vmatprep.mubr.msk.f32.mxu1 %vm1345_vm0, %v1344_v0  ;;  %s1238_s28 = sshll.u32 %s1346_s6, 4  ;;  %s1239_s28 = int_to_ptr.vmem [resolvable:$false] %s1238_s28 }
  0x60   : > { %1088 = vmatprep.subr.mxu0 %v1344_v0  ;;  %1093 = vmatprep.subr.mxu1 %v1344_v0  ;;  %p1236_p11 = pnand %p1235_p13, %p1680_p1  ;;  %s1240_s29 = scalar_lea.vmem %s1239_s28, 1024 }
  0x61   : > { %1081 = vmatmul.mubr.msk.f32.vlgmr.msra.gmra.mrb[2].mxu0 %vm248_vm1, %v246_v3  ;;  %1086 = vmatmul.mubr.msk.f32.vlgmr.msra.gmra.mrb[2].mxu1 %vm248_vm1, %v247_v4  ;;  %p1241_p5 = scmp.lt.s32.totalorder %s1571_s19, %s1239_s28  ;;  %p1242_p7 = scmp.lt.s32.totalorder %s1240_s29, %s1234_s22 }
  0x62   : > { %1089 = vmatpush3.xpose.msk.msra.mxu0 %vm248_vm1, %v244_v1  ;;  %1094 = vmatpush3.xpose.msk.msra.mxu1 %vm248_vm1, %v245_v2  ;;  %p1237_p10 = pneg %p1236_p11 }
  0x63   : > { %1090 = vmatprep.mubr.msk.f32.mxu0 %vm1345_vm0, %v1344_v0  ;;  %1095 = vmatprep.mubr.msk.f32.mxu1 %vm1345_vm0, %v1344_v0  ;;  %p1243_p9 = por %p1242_p7, %p1241_p5 }
  0x64   : > { %1098 = vmatprep.subr.mxu0 %v1344_v0  ;;  %1103 = vmatprep.subr.mxu1 %v1344_v0 }
  0x65   : > { %1091 = vmatmul.mubr.msk.f32.vlgmr.msra.gmra.mrb[4].mxu0 %vm248_vm1, %v546_v5  ;;  %1096 = vmatmul.mubr.msk.f32.vlgmr.msra.gmra.mrb[4].mxu1 %vm248_vm1, %v547_v6  ;;  %p1244_p3 = pnand %p1243_p9, %p1237_p10 }
  0x66   : > { %1099 = vmatpush3.xpose.msk.msra.mxu0 %vm248_vm1, %v246_v3  ;;  %1104 = vmatpush3.xpose.msk.msra.mxu1 %vm248_vm1, %v247_v4 }
  0x67   : > { %1100 = vmatprep.mubr.msk.f32.mxu0 %vm1345_vm0, %v1344_v0  ;;  %1105 = vmatprep.mubr.msk.f32.mxu1 %vm1345_vm0, %v1344_v0 }
  0x69   : > { %1101 = vmatmul.mubr.msk.f32.vlgmr.msra.gmra.mrb[6].mxu0 %vm248_vm1, %v548_v7  ;;  %1106 = vmatmul.mubr.msk.f32.vlgmr.msra.gmra.mrb[6].mxu1 %vm248_vm1, %v549_v8 }
 0x130   : > { %v318_v9 = vpop.f32.mrb[0].mxu0  ;;  %v391_v10 = vpop.f32.mrb[0].mxu1 }
 0x131   : > { %542 = vst.msk [vmem:[%s232_s23] sm:$0xff] %vm541_vm2, %v318_v9  ;;  %543 = vst.msk [vmem:[%s232_s23 + $0x8] sm:$0xff] %vm541_vm2, %v391_v10  ;;  %v1072_v11 = vpop.f32.mrb[1].mxu0  ;;  %v1077_v12 = vpop.f32.mrb[1].mxu1 }
 0x134   : > { %v464_v13 = vpop.f32.mrb[2].mxu0  ;;  %v537_v14 = vpop.f32.mrb[2].mxu1 }
 0x135   : > { %544 = vst.msk [vmem:[%s232_s23 + $0x10] sm:$0xff] %vm541_vm2, %v464_v13  ;;  %545 = vst.msk [vmem:[%s232_s23 + $0x18] sm:$0xff] %vm541_vm2, %v537_v14  ;;  %v1082_v15 = vpop.f32.mrb[3].mxu0  ;;  %v1087_v16 = vpop.f32.mrb[3].mxu1 }
 0x136   : > { %1247 = shalt.err (!%p1244_p3)
}
 0x137   : > { %s1248_s30 = scalar_lea.hbm %s1576_s9, 512  ;;  %s1252_s10 = scalar_lea.hbm %s1669_s2, 1024 }
 0x138   : > { %p1249_p12 = scmp.ne.s32.totalorder %s1576_s9, %s1248_s30  ;;  %p1253_p2 = scmp.lt.u32.totalorder %s1576_s9, %s1669_s2 }
 0x139   : > { %p1254_p4 = scmp.lt.u32.totalorder %s1252_s10, %s1248_s30  ;;  %p1256_p13 = scmp.lt.u32.totalorder %s1248_s30, %s1576_s9 }
 0x13a   : > { %p1250_p8 = pnand %p1249_p12, %p1680_p1 }
 0x13b   : > { %p1255_p6 = por %p1254_p4, %p1253_p2 }
 0x13c   : > { %p1251_p0 = pneg %p1250_p8 }
 0x13d   : > { %p1257_p11 = por %p1256_p13, %p1255_p6 }
 0x13f   : > { %p1258_p10 = pnand %p1257_p11, %p1251_p0 }
 0x141   : > { %1261 = shalt.err (!%p1258_p10)
}
 0x142   : > { %s1347_s4 = smov 128   ;;  %s1348_s5 = smov 8   ;;  %v619_v17 = vpop.f32.mrb[4].mxu0  ;;  %v692_v18 = vpop.f32.mrb[4].mxu1 }
 0x143   : > { %1112 = dma.vmem_to_hbm [thread:$0]  (%p1680_p1), %s1571_s19, 512, %s1576_s9, %s848_s20, %s1347_s4, %s1347_s4, %s1348_s5   ;;  %v1092_v19 = vpop.f32.mrb[5].mxu0  ;;  %v1097_v20 = vpop.f32.mrb[5].mxu1 }
 0x144   : > { %s1051_s22 = sshll.u32 %s1393_s16, 6  ;;  %843 = vst.msk [vmem:[%s1580_s11] sm:$0x1] %vm842_vm3, %v619_v17  ;;  %844 = vst.msk [vmem:[%s1580_s11 + $0x1] sm:$0x1] %vm842_vm3, %v692_v18  ;;  %v765_v21 = vpop.f32.mrb[6].mxu0 }
 0x145   : > { %s1619_s19 = scalar_lea.hbm %s1670_s3, %s1051_s22  ;;  %v838_v22 = vpop.f32.mrb[6].mxu1  ;;  %845 = vst.msk [vmem:[%s1580_s11 + $0x2] sm:$0x1] %vm842_vm3, %v765_v21  ;;  %v1102_v23 = vpop.f32.mrb[7].mxu0  ;;  %s853_s16 = scalar_lea.sflag [#allocation9], %s1520_s8 }
 0x146   : > { %846 = vst.msk [vmem:[%s1580_s11 + $0x3] sm:$0x1] %vm842_vm3, %v838_v22  ;;  %v1107_v24 = vpop.f32.mrb[7].mxu1  ;;  %s1262_s9 = scalar_lea.vmem %s1612_s17, 64  ;;  %s1349_s20 = smov [#allocation8]  }
 0x147   : > { %p1263_p5 = scmp.ne.s32.totalorder %s1612_s17, %s1262_s9  ;;  %s1266_s29 = sshll.u32 %s1349_s20, 4  ;;  %s1267_s29 = int_to_ptr.vmem [resolvable:$false] %s1266_s29 }
 0x148   : > { %s1268_s30 = scalar_lea.vmem %s1267_s29, 128  ;;  %p1269_p3 = scmp.lt.s32.totalorder %s1612_s17, %s1267_s29 }
 0x149   : > { %p1264_p7 = pnand %p1263_p5, %p1680_p1  ;;  %p1270_p12 = scmp.lt.s32.totalorder %s1268_s30, %s1262_s9 }
 0x14b   : > { %p1265_p9 = pneg %p1264_p7  ;;  %p1271_p8 = por %p1270_p12, %p1269_p3 }
 0x14d   : > { %p1272_p0 = pnand %p1271_p8, %p1265_p9 }
 0x14f   : > { %1275 = shalt.err (!%p1272_p0)
}
 0x150   : > { %s1276_s11 = scalar_lea.hbm %s1619_s19, 64  ;;  %s1280_s10 = scalar_lea.hbm %s1670_s3, 128 }
 0x151   : > { %p1277_p2 = scmp.ne.s32.totalorder %s1619_s19, %s1276_s11  ;;  %p1281_p13 = scmp.lt.u32.totalorder %s1619_s19, %s1670_s3 }
 0x152   : > { %p1282_p11 = scmp.lt.u32.totalorder %s1280_s10, %s1276_s11  ;;  %p1284_p5 = scmp.lt.u32.totalorder %s1276_s11, %s1619_s19 }
 0x153   : > { %p1278_p4 = pnand %p1277_p2, %p1680_p1 }
 0x154   : > { %p1283_p10 = por %p1282_p11, %p1281_p13 }
 0x155   : > { %p1279_p6 = pneg %p1278_p4 }
 0x156   : > { %p1285_p7 = por %p1284_p5, %p1283_p10 }
 0x158   : > { %p1286_p9 = pnand %p1285_p7, %p1279_p6 }
 0x15a   : > { %1289 = shalt.err (!%p1286_p9)
}
 0x15b   : > { %s1350_s4 = smov 16   ;;  %s1351_s5 = smov 1  }
 0x15c   : > { %1113 = dma.vmem_to_hbm [thread:$0]  (%p1680_p1), %s1612_s17, 64, %s1619_s19, %s853_s16, %s1350_s4, %s1350_s4, %s1351_s5  }
 0x15d PF: > { %s897_s22 = sand.u32 1, %s1324_s12   ;;  %p1681_p3 = scmp.ne.s32.totalorder %s1676_s25, 0 }
 0x15e   : > { %p1682_p12 = scmp.ge.s32.totalorder %s1336_s15, 2  ;;  %s898_s6 = scalar_lea.sflag [#allocation4], %s897_s22 }
 0x160   : > { %p1124_p8 = pnand %p1682_p12, %p1681_p3 }
 0x162   : > { %1315 = dma.done.wait (!%p1124_p8), %s898_s6, 512  }
 0x163   : > { %1317 = vsyncadd (!%p1124_p8), %s898_s6, 4294966784  ;;  %s907_s28 = scalar_lea.sflag [#allocation9], %s897_s22 }
 0x164   : > { %1319 = dma.done.wait (!%p1124_p8), %s907_s28, 64  }
 0x165   : > { %1321 = vsyncadd (!%p1124_p8), %s907_s28, 4294967232  ;;  %p23_p1 = scmp.ge.s32.totalorder %s1397_s18, 4   ;;  %s1683_s12 = smov %s1328_s13 }
 0x166   : > { %s1684_s13 = smov %s1332_s14  ;;  %s1685_s14 = smov %s1409_s21 }
 0x167   : > { %s1686_s15 = smov %s1397_s18  ;;  %25 = sbr.rel (!%p23_p1) target bundleno = 9 (0x9), region = 103 }
 0x16e   :  { %912 = vsyncpa [#allocation3], 1 }
 0x16f   :  { %914 = vsyncpa [#allocation3 + $0x1], 1 }
 0x170   :  { %915 = vsyncpa [#allocation6], 1 }
 0x171   :  { %917 = vsyncpa [#allocation6 + $0x1], 1 }
 0x172   :  { %918 = vsyncpa [#allocation4], 1 }
 0x173   :  { %920 = vsyncpa [#allocation4 + $0x1], 1 }
 0x174   :  { %921 = vsyncpa [#allocation9], 1 }
 0x175   :  { %923 = vsyncpa [#allocation9 + $0x1], 1 }

</bundles_post_ra>
